<compile_context>
chip_gen: v7x
topology: tpu7x:2x2x1
jax: 0.10.0
libtpu: 0.0.40
codegen_flags: <defaults>
</compile_context>

<pallas_src>
import functools

import jax
import jax.numpy as jnp
from jax.experimental import pallas as pl
from jax.experimental.pallas import tpu as pltpu


def _round_up(n, m):
    return ((n + m - 1) // m) * m


def nn_classifier_kernel(x_ref, proto_ref, temp_ref, out_ref, *, metric, eps):
    """Computes one (b_tile, c_tile) block of compute_logits(x, proto, metric, temp)."""
    x = x_ref[...]          # (bt, D) f32, D on the lane axis
    p = proto_ref[...]      # (ct, D) f32, D on the lane axis

    if metric == "cos":
        # F.normalize(v, dim=-1) == v / max(||v||_2, eps)
        x_norm = jnp.sqrt(jnp.sum(x * x, axis=-1, keepdims=True))
        p_norm = jnp.sqrt(jnp.sum(p * p, axis=-1, keepdims=True))
        x = x / jnp.maximum(x_norm, eps)
        p = p / jnp.maximum(p_norm, eps)
    # metric == "dot": raw inner products.
    # TODO(synk): metric='sqr' (negative squared distance) and the 3-D episodic-input
    # branch of utils.compute_logits are not used by this module's default config.

    # x @ p.T on the MXU (contract the shared feature dim, no in-kernel transpose).
    sims = jax.lax.dot_general(
        x, p,
        dimension_numbers=(((1,), (1,)), ((), ())),
        preferred_element_type=jnp.float32)            # (bt, ct)

    out_ref[...] = sims * temp_ref[0]                  # temperature scale


def nn_classifier_forward(x, proto, temp, *, metric="cos", eps=1e-12,
                          b_tile=128, c_tile=128):
    """x: (B, in_dim), proto: (n_classes, in_dim), temp: scalar. Returns (B, n_classes)."""
    B, D = x.shape
    C, D2 = proto.shape
    assert D == D2, (x.shape, proto.shape)

    bt = min(b_tile, _round_up(B, 8))       # batch-tile height (multiple of 8 sublanes)
    ct = min(c_tile, _round_up(C, 8))       # class-tile height
    B_pad = _round_up(B, bt)
    C_pad = _round_up(C, ct)

    x_p = jnp.pad(x.astype(jnp.float32), ((0, B_pad - B), (0, 0)))
    proto_p = jnp.pad(proto.astype(jnp.float32), ((0, C_pad - C), (0, 0)))
    temp_arr = jnp.asarray([temp], dtype=jnp.float32)   # scalar param -> SMEM

    grid = (B_pad // bt, C_pad // ct)
    kernel = functools.partial(nn_classifier_kernel, metric=metric, eps=eps)

    out = pl.pallas_call(
        kernel,
        out_shape=jax.ShapeDtypeStruct((B_pad, C_pad), jnp.float32),
        grid=grid,
        in_specs=[
            pl.BlockSpec((bt, D), lambda i, j: (i, 0)),          # x batch tile
            pl.BlockSpec((ct, D), lambda i, j: (j, 0)),          # proto class tile
            pl.BlockSpec(memory_space=pltpu.MemorySpace.SMEM),   # temp scalar
        ],
        out_specs=pl.BlockSpec((bt, ct), lambda i, j: (i, j)),
        compiler_params=pltpu.CompilerParams(
            dimension_semantics=("parallel", "parallel")),
    )(x_p, proto_p, temp_arr)

    return out[:B, :C]


def reference_forward(x, proto, temp, metric="cos", eps=1e-12):
    """Pure-JAX replica of utils.compute_logits for 2-D features."""
    if metric == "cos":
        xn = x / jnp.maximum(jnp.linalg.norm(x, axis=-1, keepdims=True), eps)
        pn = proto / jnp.maximum(jnp.linalg.norm(proto, axis=-1, keepdims=True), eps)
        logits = jnp.einsum("bd,cd->bc", xn, pn,
                            precision=jax.lax.Precision.HIGHEST)
    elif metric == "dot":
        logits = jnp.einsum("bd,cd->bc", x, proto,
                            precision=jax.lax.Precision.HIGHEST)
    else:
        raise NotImplementedError(metric)
    return logits * temp


if __name__ == "__main__":
    # Small shapes consistent with the module's forward: x (batch, in_dim), proto (n_classes, in_dim)
    B, in_dim, n_classes = 8, 32, 5
    temp = 10.0          # default learnable temperature for metric='cos'

    key = jax.random.PRNGKey(0)
    kx, kp = jax.random.split(key)
    x = jax.random.normal(kx, (B, in_dim), dtype=jnp.float32)
    # kaiming_uniform_(a=sqrt(5)) on (n_classes, in_dim) -> U(-1/sqrt(in_dim), 1/sqrt(in_dim))
    bound = 1.0 / (in_dim ** 0.5)
    proto = jax.random.uniform(kp, (n_classes, in_dim), dtype=jnp.float32,
                               minval=-bound, maxval=bound)

    logits = jax.block_until_ready(
        nn_classifier_forward(x, proto, temp, metric="cos"))
    ref = reference_forward(x, proto, temp, metric="cos")

    assert logits.shape == (B, n_classes), logits.shape
    assert jnp.allclose(logits, ref, rtol=1e-4, atol=1e-4), (logits, ref)
    print("KERNEL_OK")
</pallas_src>

<mosaic_0001>
module attributes {stable_mosaic.version = 11 : i64} {
  func.func @nn_classifier_kernel(%arg0: i32, %arg1: i32, %arg2: memref<8x32xf32, #tpu.memory_space<vmem>>, %arg3: memref<8x32xf32, #tpu.memory_space<vmem>>, %arg4: memref<1xf32, #tpu.memory_space<smem>>, %arg5: memref<8x8xf32, #tpu.memory_space<vmem>>) attributes {dimension_semantics = [#tpu.dimension_semantics<parallel>, #tpu.dimension_semantics<parallel>], iteration_bounds = array<i64: 1, 1>, scalar_prefetch = 0 : i64, scratch_operands = 0 : i64, tpu.core_type = #tpu.core_type<tc>, window_params = [{transform_indices = @transform_0, window_bounds = array<i64: 8, 32>}, {transform_indices = @transform_1, window_bounds = array<i64: 8, 32>}, {transform_indices = @transform_2, window_bounds = array<i64: 1>}, {transform_indices = @transform_3, window_bounds = array<i64: 8, 8>}]} {
    %c0 = arith.constant 0 : index
    %c0_0 = arith.constant 0 : index
    %0 = vector.load %arg2[%c0, %c0_0] : memref<8x32xf32, #tpu.memory_space<vmem>>, vector<8x32xf32>
    %c0_1 = arith.constant 0 : index
    %c0_2 = arith.constant 0 : index
    %1 = vector.load %arg3[%c0_1, %c0_2] : memref<8x32xf32, #tpu.memory_space<vmem>>, vector<8x32xf32>
    %2 = arith.mulf %0, %0 : vector<8x32xf32>
    %cst = arith.constant dense<0.000000e+00> : vector<8xf32>
    %3 = vector.multi_reduction <add>, %2, %cst [1] : vector<8x32xf32> to vector<8xf32>
    %4 = vector.shape_cast %3 : vector<8xf32> to vector<8x1xf32>
    %5 = math.sqrt %4 : vector<8x1xf32>
    %6 = arith.mulf %1, %1 : vector<8x32xf32>
    %cst_3 = arith.constant dense<0.000000e+00> : vector<8xf32>
    %7 = vector.multi_reduction <add>, %6, %cst_3 [1] : vector<8x32xf32> to vector<8xf32>
    %8 = vector.shape_cast %7 : vector<8xf32> to vector<8x1xf32>
    %9 = math.sqrt %8 : vector<8x1xf32>
    %cst_4 = arith.constant 9.99999996E-13 : f32
    %10 = vector.broadcast %cst_4 : f32 to vector<8x1xf32>
    %11 = arith.maximumf %5, %10 : vector<8x1xf32>
    %12 = vector.broadcast %11 : vector<8x1xf32> to vector<8x32xf32>
    %13 = arith.divf %0, %12 : vector<8x32xf32>
    %cst_5 = arith.constant 9.99999996E-13 : f32
    %14 = vector.broadcast %cst_5 : f32 to vector<8x1xf32>
    %15 = arith.maximumf %9, %14 : vector<8x1xf32>
    %16 = vector.broadcast %15 : vector<8x1xf32> to vector<8x32xf32>
    %17 = arith.divf %1, %16 : vector<8x32xf32>
    %cst_6 = arith.constant dense<0.000000e+00> : vector<8x8xf32>
    %18 = tpu.matmul %13, %17, %cst_6 {dimension_numbers = #tpu.dot_dimension_numbers<[1], [1], [0], [0], [0, 0, 1, 0], [], []>} : vector<8x32xf32>, vector<8x32xf32>, vector<8x8xf32> -> vector<8x8xf32>
    %c0_7 = arith.constant 0 : index
    %19 = memref.load %arg4[%c0_7] : memref<1xf32, #tpu.memory_space<smem>>
    %20 = vector.broadcast %19 : f32 to vector<8x8xf32>
    %21 = arith.mulf %18, %20 : vector<8x8xf32>
    %c0_8 = arith.constant 0 : index
    %c0_9 = arith.constant 0 : index
    %22 = vector.load %arg5[%c0_8, %c0_9] : memref<8x8xf32, #tpu.memory_space<vmem>>, vector<8x8xf32>
    tpu.vector_store %arg5[%c0_8, %c0_9], %21 {strides = array<i32>} : memref<8x8xf32, #tpu.memory_space<vmem>>, vector<8x8xf32>,
    return
  }
  func.func @transform_0(%arg0: i32, %arg1: i32) -> (i32, i32) {
    %c0_i32 = arith.constant 0 : i32
    %c0_i32_0 = arith.constant 0 : i32
    return %arg0, %c0_i32 : i32, i32
  }
  func.func @transform_1(%arg0: i32, %arg1: i32) -> (i32, i32) {
    %c0_i32 = arith.constant 0 : i32
    %c0_i32_0 = arith.constant 0 : i32
    return %arg1, %c0_i32 : i32, i32
  }
  func.func @transform_2(%arg0: i32, %arg1: i32) -> i32 {
    %c0_i32 = arith.constant 0 : i32
    %c0_i32_0 = arith.constant 0 : i32
    return %c0_i32 : i32
  }
  func.func @transform_3(%arg0: i32, %arg1: i32) -> (i32, i32) {
    %c0_i32 = arith.constant 0 : i32
    return %arg0, %arg1 : i32, i32
  }
}

</mosaic_0001>

<bundles_post_ra>
// kernel: tpu_custom_call.1
= control target key start
LH: loop header
LB: loop body
LE: loop exit
PB: predicated region body
PF: predicated region fallthrough
CT: control target
= control target key end

     0   :  { %9 = vsyncpa [#allocation4], 0  ;;  %s330_s0 = inlined_call_operand.hbm [shape: f32[8,32], index: 0, kind: input, shape index: {}]   ;;  %s331_s1 = inlined_call_operand.hbm [shape: f32[8,32], index: 1, kind: input, shape index: {}]   ;;  %s332_s2 = inlined_call_operand.<no memory space> [shape: f32[1], index: 2, kind: input, shape index: {}]   ;;  %s333_s3 = inlined_call_operand.hbm [shape: f32[8,8], index: 3, kind: output, shape index: {}]  }
   0x1   :  { %10 = vsyncpa [#allocation7], 0 }
   0x2   :  { %11 = vsyncpa [#allocation5], 0  ;;  %s262_s12 = smov [#allocation3]   ;;  %s263_s14 = smov [#allocation6]  }
   0x3   :  { %s18_s13 = sshll.u32 %s262_s12, 4  ;;  %s28_s15 = sshll.u32 %s263_s14, 4  ;;  %s19_s13 = int_to_ptr.vmem [resolvable:$true] %s18_s13  ;;  %s29_s15 = int_to_ptr.vmem [resolvable:$true] %s28_s15 }
   0x4   :  { %s190_s18 = scalar_lea.hbm %s330_s0, 128 }
   0x5   :  { %p191_p0 = scmp.ne.s32.totalorder %s330_s0, %s190_s18  ;;  %p194_p1 = scmp.lt.u32.totalorder %s190_s18, %s330_s0 }
   0x7   :  { %p196_p2 = pnand %p194_p1, %p191_p0 }
   0x9   :  { %199 = shalt.err (!%p196_p2)
}
   0xa   :  { %s200_s23 = scalar_lea.vmem %s19_s13, 128  ;;  %p205_p4 = scmp.lt.s32.totalorder %s19_s13, %s19_s13 }
   0xb   :  { %p201_p3 = scmp.ne.s32.totalorder %s19_s13, %s200_s23  ;;  %p206_p5 = scmp.lt.s32.totalorder %s200_s23, %s200_s23 }
   0xd   :  { %p207_p6 = por %p206_p5, %p205_p4 }
   0xf   :  { %p208_p7 = pnand %p207_p6, %p201_p3 }
  0x11   :  { %211 = shalt.err (!%p208_p7)
}
  0x12   :  { %21 = dma.hbm_to_vmem [thread:$0]  %s330_s0, 128, %s19_s13, [#allocation4]  }
  0x13   :  { %s212_s28 = scalar_lea.hbm %s331_s1, 128 }
  0x14   :  { %p213_p8 = scmp.ne.s32.totalorder %s331_s1, %s212_s28  ;;  %p216_p9 = scmp.lt.u32.totalorder %s212_s28, %s331_s1 }
  0x16   :  { %p218_p10 = pnand %p216_p9, %p213_p8 }
  0x18   :  { %221 = shalt.err (!%p218_p10)
}
  0x19   :  { %s222_s6 = scalar_lea.vmem %s29_s15, 128  ;;  %p227_p12 = scmp.lt.s32.totalorder %s29_s15, %s29_s15 }
  0x1a   :  { %p223_p11 = scmp.ne.s32.totalorder %s29_s15, %s222_s6  ;;  %p228_p13 = scmp.lt.s32.totalorder %s222_s6, %s222_s6 }
  0x1c   :  { %p229_p0 = por %p228_p13, %p227_p12 }
  0x1e   :  { %p230_p1 = pnand %p229_p0, %p223_p11 }
  0x20   :  { %233 = shalt.err (!%p230_p1)
}
  0x21   :  { %31 = dma.hbm_to_vmem [thread:$0]  %s331_s1, 128, %s29_s15, [#allocation7]  }
  0x22   :  { %256 = dma.done.wait [#allocation4], 128  }
  0x23   :  { %257 = vsyncadd [#allocation4], 4294967168 }
  0x24   :  { %258 = dma.done.wait [#allocation7], 128  }
  0x25   :  { %259 = vsyncadd [#allocation7], 4294967168  ;;  %v41_v0 = vld [vmem:[#allocation6] sm:$0xff]  ;;  %vm43_vm0 = vcmask 261120   ;;  %v40_v1 = vld [vmem:[#allocation3] sm:$0xff]  ;;  %v264_v6 = vmov 0.0   ;;  %v148_v25 = vstv %s332_s2 }
  0x26   :  { %v54_v2 = vmul.f32 %v41_v0, %v41_v0  ;;  %v42_v3 = vmul.f32 %v40_v1, %v40_v1  ;;  %172 = vmatprep.subr.mxu0 %v264_v6  ;;  %vm265_vm1 = vmmov 0   ;;  %s266_s9 = smov [#allocation8]   ;;  %vm150_vm6 = vcmask 64512  }
  0x27   :  { %174 = vmatprep.mubr.msk.f32.mxu0 %vm265_vm1, %v264_v6  ;;  %s158_s10 = sshll.u32 %s266_s9, 4  ;;  %s159_s10 = int_to_ptr.vmem [resolvable:$true] %s158_s10 }
  0x28   :  { %v55_v4 = vsel %vm43_vm0, %v54_v2, 0.0  ;;  %v44_v5 = vsel %vm43_vm0, %v42_v3, 0.0  ;;  %s234_s11 = scalar_lea.vmem %s159_s10, 128  ;;  %p239_p3 = scmp.lt.s32.totalorder %s159_s10, %s159_s10 }
  0x29   :  { %56 = vadd.xlane.f32.xlu0 %v55_v4  ;;  %p235_p2 = scmp.ne.s32.totalorder %s159_s10, %s234_s11  ;;  %p240_p4 = scmp.lt.s32.totalorder %s234_s11, %s234_s11 }
  0x2b   :  { %p241_p5 = por %p240_p4, %p239_p3 }
  0x2d   :  { %45 = vadd.xlane.f32.xlu0 %v44_v5  ;;  %p242_p6 = pnand %p241_p5, %p235_p2 }
  0xb6   :  { %v57_v7 = vpop.xlane.xlu0 %56 }
  0xb7   :  { %182 = vrsqrt.f32 %v57_v7  ;;  %vm60_vm2 = vcmp.eq.f32.partialorder %v57_v7, inf  ;;  %v63_v11 = vand.u32 2147483648, %v57_v7  ;;  %vm62_vm3 = vcmp.eq.f32.partialorder %v57_v7, 0.0 }
  0xba   :  { %v46_v8 = vpop.xlane.xlu0 %45 }
  0xbb   :  { %184 = vrsqrt.f32 %v46_v8  ;;  %vm49_vm4 = vcmp.eq.f32.partialorder %v46_v8, inf  ;;  %v52_v17 = vand.u32 2147483648, %v46_v8  ;;  %vm51_vm5 = vcmp.eq.f32.partialorder %v46_v8, 0.0 }
  0xc1   :  { %v183_v9 = vpop.eup %182 }
  0xc2   :  { %v59_v10 = vmul.f32 %v183_v9, %v57_v7 }
  0xc4   :  { %v61_v12 = vsel %vm60_vm2, %v57_v7, %v59_v10 }
  0xc5   :  { %v185_v13 = vpop.eup %184  ;;  %v64_v14 = vsel %vm62_vm3, %v63_v11, %v61_v12 }
  0xc6   :  { %v68_v15 = vmax.f32 %v64_v14, 1e-12  ;;  %v48_v16 = vmul.f32 %v185_v13, %v46_v8 }
  0xc8   :  { %186 = vrcp.f32 %v68_v15  ;;  %v50_v18 = vsel %vm49_vm4, %v46_v8, %v48_v16 }
  0xc9   :  { %v53_v19 = vsel %vm51_vm5, %v52_v17, %v50_v18 }
  0xca   :  { %v65_v20 = vmax.f32 %v53_v19, 1e-12 }
  0xcc   :  { %188 = vrcp.f32 %v65_v20 }
  0xd2   :  { %v187_v21 = vpop.eup %186 }
  0xd3   :  { %v70_v22 = vmul.f32 %v187_v21, %v41_v0 }
  0xd5   :  { %173 = vmatpush3.xpose.msk.msra.mxu0 %vm43_vm0, %v70_v22 }
  0xd6   :  { %v189_v23 = vpop.eup %188 }
  0xd7   :  { %v67_v24 = vmul.f32 %v189_v23, %v40_v1 }
  0xd9   :  { %175 = vmatmul.mubr.msk.f32.vlgmr.msra.gmra.mrb[0].mxu0 %vm43_vm0, %v67_v24 }
 0x1ac   :  { %v143_v26 = vpop.f32.mrb[0].mxu0 }
 0x1ad   :  { %v149_v27 = vmul.f32 %v148_v25, %v143_v26  ;;  %v176_v28 = vpop.f32.mrb[1].mxu0 }
 0x1af   :  { %151 = vst.msk [vmem:[#allocation8] sm:$0xff] %vm150_vm6, %v149_v27 }
 0x1b0   :  { %245 = shalt.err (!%p242_p6)
}
 0x1b1   :  { %s246_s14 = scalar_lea.hbm %s333_s3, 128 }
 0x1b2   :  { %p247_p7 = scmp.ne.s32.totalorder %s333_s3, %s246_s14  ;;  %p250_p8 = scmp.lt.u32.totalorder %s246_s14, %s333_s3 }
 0x1b4   :  { %p252_p9 = pnand %p250_p8, %p247_p7 }
 0x1b6   :  { %255 = shalt.err (!%p252_p9)
}
 0x1b7   :  { %161 = dma.vmem_to_hbm [thread:$0]  %s159_s10, 128, %s333_s3, [#allocation5]  }
 0x1b8   :  { %260 = dma.done.wait [#allocation5], 128  }
 0x1b9   :  { %261 = vsyncadd [#allocation5], 4294967168 }
 0x1ba   :  { %165 = vsyncpa [#allocation4], 1 }
 0x1bb   :  { %166 = vsyncpa [#allocation7], 1 }
 0x1bc   :  { %167 = vsyncpa [#allocation5], 1 }

</bundles_post_ra>
